<compile_context>
chip_gen: v7x
topology: tpu7x:2x2x1
jax: 0.10.0
libtpu: 0.0.40
codegen_flags: <defaults>
</compile_context>

<pallas_src>
import jax
import jax.numpy as jnp
from jax.experimental import pallas as pl
from jax.experimental.pallas import tpu as pltpu


LANE_WIDTH = 1024           # lane-dense last dim (multiple of 128)
MIN_PALLAS_ELEMS = 1 << 16  # below this, the fused XLA path wins on launch cost


def _round_up(a, m):
    return ((a + m - 1) // m) * m


def _chip_tuning():
    """Return (tile_rows, vmem_limit_bytes) for the current TPU generation."""
    try:
        kind = jax.devices()[0].device_kind.lower()
    except Exception:  # pragma: no cover - defensive default
        kind = ""
    if "v5" in kind:
        # v5e: 16 MiB default scoped VMEM -> 2 MiB blocks (8 MiB double-buffered
        # in+out, still ~85% of HBM roofline); raise the limit for headroom.
        return 512, 64 << 20
    if "v6" in kind:
        return 1024, 64 << 20
    if "7x" in kind or "v7" in kind or "tpu7" in kind:
        # v7x: ~3.2 TB/s HBM per TC drains a block in a few us, so bigger tiles
        # amortize the fixed grid-step overhead; 48 MiB < 64 MiB physical VMEM.
        return 2048, 48 << 20
    return 1024, 64 << 20


def _affine_kernel(w_ref, b_ref, x_ref, o_ref):
    # w_ref / b_ref: (1, 1) f32 scalars in SMEM; x_ref / o_ref: lane-dense VMEM
    # tiles.  One VPU vmul + vadd per vreg; the HBM DMA is the bottleneck.
    w = w_ref[0, 0]
    b = b_ref[0, 0]
    o_ref[...] = (x_ref[...].astype(jnp.float32) * w + b).astype(o_ref.dtype)


def _lane_dense_affine(x2d, w2, b2, *, alias_input=False):
    """Run the affine kernel over a lane-dense (rows, LANE_WIDTH) view."""
    rows, c = x2d.shape
    tile_rows, vmem_limit = _chip_tuning()
    if rows > tile_rows:
        tile_r = tile_rows
    elif rows >= 16:
        # Mid-size: split into >= 2 row blocks so the "parallel" grid axis can
        # shard across v7x's two TensorCores.
        tile_r = _round_up(pl.cdiv(rows, 2), 8)
    else:
        tile_r = rows  # single full-dim block (always legal)
    grid = (pl.cdiv(rows, tile_r),)  # partial last block is masked by Pallas

    # Donate the input buffer only when the caller tells us it is a fresh temp
    # (padded path).  On the free-reshape path the input aliases the caller's x,
    # so donation would just force XLA to insert a defensive copy.
    alias = {2: 0} if alias_input else {}

    return pl.pallas_call(
        _affine_kernel,
        out_shape=jax.ShapeDtypeStruct((rows, c), x2d.dtype),
        grid=grid,
        in_specs=[
            pl.BlockSpec(memory_space=pltpu.SMEM),        # weight scalar (1, 1)
            pl.BlockSpec(memory_space=pltpu.SMEM),        # bias scalar   (1, 1)
            pl.BlockSpec((tile_r, c), lambda i: (i, 0)),  # row-tiled input
        ],
        out_specs=pl.BlockSpec((tile_r, c), lambda i: (i, 0)),
        input_output_aliases=alias,
        compiler_params=pltpu.CompilerParams(
            dimension_semantics=("parallel",),
            vmem_limit_bytes=vmem_limit,
        ),
    )(w2, b2, x2d)


def simple_nn_forward(x, weight, bias, *, use_pallas=None):
    """x: (N, 1), weight: (1, 1), bias: (1,) -> (N, 1) in x's dtype."""
    n, f = x.shape
    assert f == 1 and weight.shape == (1, 1) and bias.shape == (1,)

    w2 = weight.astype(jnp.float32).reshape(1, 1)
    b2 = bias.astype(jnp.float32).reshape(1, 1)
    lane_aligned = (n % LANE_WIDTH == 0)

    if use_pallas is None:
        # Pallas only pays off when the lane-dense 2-D view is a free reshape
        # (no pad / slice HBM round-trips) and the tensor is big enough to hide
        # launch + grid-step overhead.  Otherwise the fused XLA x*w+b is already
        # a single roofline-bound streaming kernel.
        use_pallas = lane_aligned and n >= MIN_PALLAS_ELEMS

    if not use_pallas:
        out = x.astype(jnp.float32) * w2[0, 0] + b2[0, 0]
        return out.astype(x.dtype)

    if lane_aligned:
        # Main path: both reshapes are free views of the contiguous buffer.
        x2d = x.reshape(n // LANE_WIDTH, LANE_WIDTH)
        out2d = _lane_dense_affine(x2d, w2, b2)
        return out2d.reshape(n, 1)

    # Forced-Pallas path for non-lane-aligned N (coverage / debug only): pad to
    # the next 1024-element multiple (NOT to a full tile multiple) and slice
    # back; the padded temp is donated to the output buffer.
    rows = pl.cdiv(n, LANE_WIDTH)
    total = rows * LANE_WIDTH
    x2d = jnp.pad(x.reshape(-1), (0, total - n)).reshape(rows, LANE_WIDTH)
    out2d = _lane_dense_affine(x2d, w2, b2, alias_input=True)
    return out2d.reshape(-1)[:n].reshape(n, 1)


if __name__ == "__main__":
    key = jax.random.PRNGKey(0)
    kx, kw, kb, k1, k2, k3 = jax.random.split(key, 6)

    # PyTorch Linear(1, 1) init: bound = 1 / sqrt(in_features) = 1.
    weight = jax.random.uniform(kw, (1, 1), jnp.float32, -1.0, 1.0)
    bias = jax.random.uniform(kb, (1,), jnp.float32, -1.0, 1.0)

    def ref_fn(x):
        return x @ weight.T + bias

    # 1) Small module-consistent batch (N=8): auto path -> fused XLA fallback.
    x_small = jax.random.normal(kx, (8, 1), jnp.float32)
    out_small = simple_nn_forward(x_small, weight, bias)
    jax.block_until_ready(out_small)
    assert out_small.shape == (8, 1)
    assert jnp.allclose(out_small, ref_fn(x_small), atol=1e-6), "auto-path mismatch"

    # 2) Lane-aligned small batch forced through Pallas: free-reshape path with
    #    a single full-dim block (no padding, no slicing).
    x_4k = jax.random.normal(k1, (4 * LANE_WIDTH, 1), jnp.float32)
    out_4k = simple_nn_forward(x_4k, weight, bias, use_pallas=True)
    jax.block_until_ready(out_4k)
    assert jnp.allclose(out_4k, ref_fn(x_4k), atol=1e-6), "pallas aligned-small mismatch"

    # 3) Larger lane-aligned batch whose row count (2072) is not a tile multiple
    #    on any chip generation: multi-step grid + masked partial last block,
    #    still zero wrapper-side copies.
    n_big = (2048 + 24) * LANE_WIDTH  # 2,121,728 elements (~8.5 MB f32)
    x_big = jax.random.normal(k2, (n_big, 1), jnp.float32)
    out_big = simple_nn_forward(x_big, weight, bias)  # auto -> Pallas
    jax.block_until_ready(out_big)
    assert out_big.shape == (n_big, 1)
    assert jnp.allclose(out_big, ref_fn(x_big), atol=1e-5), "pallas big mismatch"

    # 4) Non-lane-aligned N forced through Pallas: exercises the minimal-padding
    #    fallback (the auto heuristic routes this size to XLA instead).
    x_odd = jax.random.normal(k3, (5000, 1), jnp.float32)
    out_odd = simple_nn_forward(x_odd, weight, bias, use_pallas=True)
    jax.block_until_ready(out_odd)
    assert jnp.allclose(out_odd, ref_fn(x_odd), atol=1e-6), "pallas padded mismatch"

    print("KERNEL_OK")
</pallas_src>

<mosaic_0001>
module attributes {stable_mosaic.version = 11 : i64} {
  func.func @_affine_kernel(%arg0: i32, %arg1: memref<1x1xf32, #tpu.memory_space<smem>>, %arg2: memref<1x1xf32, #tpu.memory_space<smem>>, %arg3: memref<4x1024xf32, #tpu.memory_space<vmem>>, %arg4: memref<4x1024xf32, #tpu.memory_space<vmem>>) attributes {dimension_semantics = [#tpu.dimension_semantics<parallel>], iteration_bounds = array<i64: 1>, scalar_prefetch = 0 : i64, scratch_operands = 0 : i64, tpu.core_type = #tpu.core_type<tc>, window_params = [{transform_indices = @transform_0, window_bounds = array<i64: 1, 1>}, {transform_indices = @transform_1, window_bounds = array<i64: 1, 1>}, {transform_indices = @transform_2, window_bounds = array<i64: 4, 1024>}, {transform_indices = @transform_3, window_bounds = array<i64: 4, 1024>}]} {
    %c0 = arith.constant 0 : index
    %c0_0 = arith.constant 0 : index
    %0 = memref.load %arg1[%c0, %c0_0] : memref<1x1xf32, #tpu.memory_space<smem>>
    %c0_1 = arith.constant 0 : index
    %c0_2 = arith.constant 0 : index
    %1 = memref.load %arg2[%c0_1, %c0_2] : memref<1x1xf32, #tpu.memory_space<smem>>
    %c0_3 = arith.constant 0 : index
    %c0_4 = arith.constant 0 : index
    %2 = vector.load %arg3[%c0_3, %c0_4] : memref<4x1024xf32, #tpu.memory_space<vmem>>, vector<4x1024xf32>
    %3 = vector.broadcast %0 : f32 to vector<4x1024xf32>
    %4 = arith.mulf %2, %3 : vector<4x1024xf32>
    %5 = vector.broadcast %1 : f32 to vector<4x1024xf32>
    %6 = arith.addf %4, %5 : vector<4x1024xf32>
    %c0_5 = arith.constant 0 : index
    %c0_6 = arith.constant 0 : index
    %7 = vector.load %arg4[%c0_5, %c0_6] : memref<4x1024xf32, #tpu.memory_space<vmem>>, vector<4x1024xf32>
    tpu.vector_store %arg4[%c0_5, %c0_6], %6 {strides = array<i32>} : memref<4x1024xf32, #tpu.memory_space<vmem>>, vector<4x1024xf32>,
    return
  }
  func.func @transform_0(%arg0: i32) -> (i32, i32) {
    %c0_i32 = arith.constant 0 : i32
    %c0_i32_0 = arith.constant 0 : i32
    %c0_i32_1 = arith.constant 0 : i32
    return %c0_i32, %c0_i32_0 : i32, i32
  }
  func.func @transform_1(%arg0: i32) -> (i32, i32) {
    %c0_i32 = arith.constant 0 : i32
    %c0_i32_0 = arith.constant 0 : i32
    %c0_i32_1 = arith.constant 0 : i32
    return %c0_i32, %c0_i32_0 : i32, i32
  }
  func.func @transform_2(%arg0: i32) -> (i32, i32) {
    %c0_i32 = arith.constant 0 : i32
    %c0_i32_0 = arith.constant 0 : i32
    return %arg0, %c0_i32 : i32, i32
  }
  func.func @transform_3(%arg0: i32) -> (i32, i32) {
    %c0_i32 = arith.constant 0 : i32
    %c0_i32_0 = arith.constant 0 : i32
    return %arg0, %c0_i32 : i32, i32
  }
}

</mosaic_0001>

<bundles_post_ra>
// kernel: tpu_custom_call.1
= control target key start
LH: loop header
LB: loop body
LE: loop exit
PB: predicated region body
PF: predicated region fallthrough
CT: control target
= control target key end

     0   :  { %10 = vsyncpa [#allocation5], 0  ;;  %s166_s0 = inlined_call_operand.<no memory space> [shape: f32[1,1], index: 0, kind: input, shape index: {}]   ;;  %s167_s1 = inlined_call_operand.<no memory space> [shape: f32[1,1], index: 1, kind: input, shape index: {}]   ;;  %s168_s2 = inlined_call_operand.hbm [shape: f32[4,1024], index: 2, kind: input, shape index: {}]   ;;  %s169_s3 = inlined_call_operand.hbm [shape: f32[4,1024], index: 3, kind: output, shape index: {}]  }
   0x1   :  { %11 = vsyncpa [#allocation6], 0  ;;  %s114_s12 = smov [#allocation4]   ;;  %s66_s16 = scalar_lea.hbm %s168_s2, 512 }
   0x2   :  { %s22_s13 = sshll.u32 %s114_s12, 4  ;;  %p67_p0 = scmp.ne.s32.totalorder %s168_s2, %s66_s16  ;;  %s23_s13 = int_to_ptr.vmem [resolvable:$true] %s22_s13 }
   0x3   :  { %p70_p1 = scmp.lt.u32.totalorder %s66_s16, %s168_s2 }
   0x5   :  { %p72_p2 = pnand %p70_p1, %p67_p0 }
   0x7   :  { %75 = shalt.err (!%p72_p2)
}
   0x8   :  { %s76_s21 = scalar_lea.vmem %s23_s13, 512  ;;  %p81_p4 = scmp.lt.s32.totalorder %s23_s13, %s23_s13 }
   0x9   :  { %p77_p3 = scmp.ne.s32.totalorder %s23_s13, %s76_s21  ;;  %p82_p5 = scmp.lt.s32.totalorder %s76_s21, %s76_s21 }
   0xb   :  { %p83_p6 = por %p82_p5, %p81_p4 }
   0xd   :  { %p84_p7 = pnand %p83_p6, %p77_p3 }
   0xf   :  { %87 = shalt.err (!%p84_p7)
}
  0x10   :  { %25 = dma.hbm_to_vmem [thread:$0]  %s168_s2, 512, %s23_s13, [#allocation5]  }
  0x11   :  { %110 = dma.done.wait [#allocation5], 512  }
  0x12   :  { %111 = vsyncadd [#allocation5], 4294966784  ;;  %v35_v0 = vstv %s166_s0  ;;  %v31_v1 = vld [vmem:[#allocation4] sm:$0xff]  ;;  %v40_v2 = vstv %s167_s1  ;;  %v32_v3 = vld [vmem:[#allocation4 + $0x8] sm:$0xff]  ;;  %s115_s28 = smov [#allocation7]  }
  0x13   :  { %v33_v4 = vld [vmem:[#allocation4 + $0x10] sm:$0xff]  ;;  %v36_v5 = vmul.f32 %v35_v0, %v31_v1  ;;  %v37_v6 = vmul.f32 %v35_v0, %v32_v3  ;;  %v34_v8 = vld [vmem:[#allocation4 + $0x18] sm:$0xff]  ;;  %s55_s29 = sshll.u32 %s115_s28, 4  ;;  %s56_s29 = int_to_ptr.vmem [resolvable:$true] %s55_s29 }
  0x14   :  { %v38_v7 = vmul.f32 %v35_v0, %v33_v4  ;;  %v39_v9 = vmul.f32 %v35_v0, %v34_v8  ;;  %s88_s0 = scalar_lea.vmem %s56_s29, 512  ;;  %p93_p9 = scmp.lt.s32.totalorder %s56_s29, %s56_s29 }
  0x15   :  { %v41_v10 = vadd.f32 %v40_v2, %v36_v5  ;;  %v42_v11 = vadd.f32 %v40_v2, %v37_v6  ;;  %p89_p8 = scmp.ne.s32.totalorder %s56_s29, %s88_s0  ;;  %p94_p10 = scmp.lt.s32.totalorder %s88_s0, %s88_s0 }
  0x16   :  { %v43_v12 = vadd.f32 %v40_v2, %v38_v7  ;;  %v44_v13 = vadd.f32 %v40_v2, %v39_v9 }
  0x17   :  { %45 = vst [vmem:[#allocation7] sm:$0xff] %v41_v10  ;;  %46 = vst [vmem:[#allocation7 + $0x8] sm:$0xff] %v42_v11  ;;  %p95_p11 = por %p94_p10, %p93_p9 }
  0x18   :  { %47 = vst [vmem:[#allocation7 + $0x10] sm:$0xff] %v43_v12  ;;  %48 = vst [vmem:[#allocation7 + $0x18] sm:$0xff] %v44_v13 }
  0x19   :  { %p96_p12 = pnand %p95_p11, %p89_p8 }
  0x1b   :  { %99 = shalt.err (!%p96_p12)
}
  0x1c   :  { %s100_s30 = scalar_lea.hbm %s169_s3, 512 }
  0x1d   :  { %p101_p13 = scmp.ne.s32.totalorder %s169_s3, %s100_s30  ;;  %p104_p0 = scmp.lt.u32.totalorder %s100_s30, %s169_s3 }
  0x1f   :  { %p106_p1 = pnand %p104_p0, %p101_p13 }
  0x21   :  { %109 = shalt.err (!%p106_p1)
}
  0x22   :  { %58 = dma.vmem_to_hbm [thread:$0]  %s56_s29, 512, %s169_s3, [#allocation6]  }
  0x23   :  { %112 = dma.done.wait [#allocation6], 512  }
  0x24   :  { %113 = vsyncadd [#allocation6], 4294966784 }
  0x25   :  { %62 = vsyncpa [#allocation5], 1 }
  0x26   :  { %63 = vsyncpa [#allocation6], 1 }

</bundles_post_ra>
